<compile_context>
chip_gen: v6e
topology: v6e:2x2x1
jax: 0.10.0
libtpu: 0.0.40
codegen_flags: <defaults>
</compile_context>

<pallas_src>
import jax
import jax.numpy as jnp
from jax.experimental import pallas as pl
from jax.experimental.pallas import tpu as pltpu


def _round_up(x, m):
    return (x + m - 1) // m * m


def _pick_tile(n, candidates):
    for c in candidates:
        if c <= n and n % c == 0:
            return c
    return n


def _make_kernel(aggregate_first):
    """aggregate_first=True  : acc = sum_k A[i,k] @ X[k]          (F narrower)
       aggregate_first=False : acc = sum_k A[i,k] @ (X[k] @ W1^T) (E narrower)"""

    def kernel(adj_ref, x_ref, w1t_ref, w2t_ref, o_ref, acc_ref):
        k = pl.program_id(1)

        @pl.when(k == 0)
        def _init():
            acc_ref[...] = jnp.zeros_like(acc_ref)

        if aggregate_first:
            # (TM,TK) @ (TK,Fp) -> (TM,Fp), contracting N against the narrow F dim.
            acc_ref[...] += jnp.dot(adj_ref[...], x_ref[...],
                                    preferred_element_type=jnp.float32)
        else:
            # Transform features first (cheaper when embed_dim < in_features).
            # NOTE: recomputed per row-tile; fine for modest row-grid counts.
            xw = jnp.dot(x_ref[...], w1t_ref[...],
                         preferred_element_type=jnp.float32)
            acc_ref[...] += jnp.dot(adj_ref[...], xw.astype(jnp.bfloat16),
                                    preferred_element_type=jnp.float32)

        @pl.when(k == pl.num_programs(1) - 1)
        def _finalize():
            if aggregate_first:
                h = jnp.dot(acc_ref[...].astype(jnp.bfloat16), w1t_ref[...],
                            preferred_element_type=jnp.float32)
            else:
                h = acc_ref[...]
            h = jnp.maximum(h, 0.0)  # Encoder ReLU
            o_ref[...] = jnp.dot(h.astype(jnp.bfloat16), w2t_ref[...],
                                 preferred_element_type=jnp.float32
                                 ).astype(o_ref.dtype)

    return kernel


def supervised_graphsage(x, adj_mean, w_enc, w_cls, *, tm=None, tk=None):
    """Fused forward pass.

    x:        (N, F)  node features
    adj_mean: (N, N)  row-normalised adjacency (mean aggregation incl. self)
    w_enc:    (E, F)  Encoder weight
    w_cls:    (C, E)  SupervisedGraphSage.weight
    returns   (N, C)  float32 scores (== scores.t() in the PyTorch module)
    """
    n, f = x.shape
    e = w_enc.shape[0]
    c = w_cls.shape[0]

    # ---- pad everything lane/sublane dense -------------------------------
    n_p = _round_up(n, 128)
    f_p = _round_up(f, 128)
    e_p = _round_up(e, 128)
    c_p = _round_up(c, 128)

    bf = jnp.bfloat16
    a_p = jnp.zeros((n_p, n_p), bf).at[:n, :n].set(adj_mean.astype(bf))
    x_p = jnp.zeros((n_p, f_p), bf).at[:n, :f].set(x.astype(bf))
    w1t = jnp.zeros((f_p, e_p), bf).at[:f, :e].set(w_enc.T.astype(bf))
    w2t = jnp.zeros((e_p, c_p), bf).at[:e, :c].set(w_cls.T.astype(bf))

    # Reassociation: contract the N x N matmul against the narrower feature dim.
    aggregate_first = f <= e
    acc_cols = f_p if aggregate_first else e_p

    tm = tm or _pick_tile(n_p, (256, 128))
    tk = tk or _pick_tile(n_p, (512, 256, 128))
    grid = (n_p // tm, n_p // tk)

    flops = 2 * (n_p * n_p * acc_cols + n_p * f_p * e_p + n_p * e_p * c_p)
    bytes_accessed = 2 * (a_p.size + x_p.size + w1t.size + w2t.size) + 4 * n_p * c_p

    out_p = pl.pallas_call(
        _make_kernel(aggregate_first),
        out_shape=jax.ShapeDtypeStruct((n_p, c_p), jnp.float32),
        grid_spec=pltpu.PrefetchScalarGridSpec(
            num_scalar_prefetch=0,
            grid=grid,
            in_specs=[
                pl.BlockSpec((tm, tk), lambda i, k: (i, k)),    # adjacency tile
                pl.BlockSpec((tk, f_p), lambda i, k: (k, 0)),   # feature rows
                pl.BlockSpec((f_p, e_p), lambda i, k: (0, 0)),  # W_enc^T (resident)
                pl.BlockSpec((e_p, c_p), lambda i, k: (0, 0)),  # W_cls^T (resident)
            ],
            out_specs=pl.BlockSpec((tm, c_p), lambda i, k: (i, 0)),
            scratch_shapes=[pltpu.VMEM((tm, acc_cols), jnp.float32)],
        ),
        compiler_params=pltpu.CompilerParams(
            dimension_semantics=("parallel", "arbitrary")),
        cost_estimate=pl.CostEstimate(flops=flops, transcendentals=0,
                                      bytes_accessed=bytes_accessed),
    )(a_p, x_p, w1t, w2t)

    return out_p[:n, :c]


def reference(x, adj_mean, w_enc, w_cls):
    agg = adj_mean @ x                          # MeanAggregator
    embeds = jnp.maximum(w_enc @ agg.T, 0.0)    # Encoder: relu(W.mm(combined.t()))
    scores = w_cls @ embeds                     # SupervisedGraphSage: weight.mm(embeds)
    return scores.T                             # scores.t()


# TODO(synk): the gcn=False Encoder variant (concat of self + neighbour feats) and
# the CrossEntropyLoss `.loss()` method are not implemented (loss is training-only).


def _run_case(key, n, f, e, c):
    k_x, k_a, k_we, k_wc = jax.random.split(key, 4)
    x = jax.random.normal(k_x, (n, f), dtype=jnp.float32)

    # Binary symmetric adjacency with self loops, row-normalised (mean aggregation).
    a = (jax.random.uniform(k_a, (n, n)) > 0.7).astype(jnp.float32)
    a = jnp.maximum(a, a.T) + jnp.eye(n, dtype=jnp.float32)
    adj_mean = a / a.sum(axis=1, keepdims=True)

    # Encoder weight: uniform Kaiming-ish; classifier weight: xavier_uniform
    # (matches init.xavier_uniform in the PyTorch module).
    stdv = 1.0 / jnp.sqrt(jnp.float32(f))
    w_enc = jax.random.uniform(k_we, (e, f), jnp.float32, minval=-stdv, maxval=stdv)
    bound = jnp.sqrt(6.0 / jnp.float32(c + e))
    w_cls = jax.random.uniform(k_wc, (c, e), jnp.float32, minval=-bound, maxval=bound)

    out = supervised_graphsage(x, adj_mean, w_enc, w_cls)
    jax.block_until_ready(out)

    ref = reference(x, adj_mean, w_enc, w_cls)
    assert out.shape == (n, c)
    # bf16 MXU inputs with f32 accumulation -> loosened tolerance vs f32 reference.
    assert jnp.allclose(out, ref, atol=5e-2, rtol=5e-2), float(jnp.max(jnp.abs(out - ref)))


if __name__ == "__main__":
    key = jax.random.PRNGKey(0)
    k1, k2 = jax.random.split(key)

    # Case 1: in_features < embed_dim -> aggregate-first association.
    _run_case(k1, n=64, f=32, e=128, c=7)
    # Case 2: embed_dim < in_features -> transform-first association.
    _run_case(k2, n=64, f=128, e=64, c=7)

    print("KERNEL_OK")
</pallas_src>

<mosaic_0001>
module attributes {stable_mosaic.version = 11 : i64} {
  func.func @kernel(%arg0: i32, %arg1: i32, %arg2: memref<128x128xbf16, #tpu.memory_space<vmem>>, %arg3: memref<128x128xbf16, #tpu.memory_space<vmem>>, %arg4: memref<128x128xbf16, #tpu.memory_space<vmem>>, %arg5: memref<128x128xbf16, #tpu.memory_space<vmem>>, %arg6: memref<128x128xf32, #tpu.memory_space<vmem>>, %arg7: memref<128x128xf32, #tpu.memory_space<vmem>>) attributes {dimension_semantics = [#tpu.dimension_semantics<parallel>, #tpu.dimension_semantics<arbitrary>], iteration_bounds = array<i64: 1, 1>, scalar_prefetch = 0 : i64, scratch_operands = 1 : i64, tpu.core_type = #tpu.core_type<tc>, window_params = [{transform_indices = @transform_0, window_bounds = array<i64: 128, 128>}, {transform_indices = @transform_1, window_bounds = array<i64: 128, 128>}, {pipeline_mode = #tpu.pipeline_mode<synchronous>, transform_indices = @transform_2, window_bounds = array<i64: 128, 128>}, {pipeline_mode = #tpu.pipeline_mode<synchronous>, transform_indices = @transform_3, window_bounds = array<i64: 128, 128>}, {transform_indices = @transform_4, window_bounds = array<i64: 128, 128>}]} {
    %c0_i32 = arith.constant 0 : i32
    %0 = arith.cmpi eq, %arg1, %c0_i32 : i32
    %1 = arith.extui %0 : i1 to i32
    %c0_i32_0 = arith.constant 0 : i32
    %2 = arith.cmpi ne, %1, %c0_i32_0 : i32
    scf.if %2 {
      %cst_10 = arith.constant 0.000000e+00 : f32
      %12 = vector.broadcast %cst_10 : f32 to vector<128x128xf32>
      %c0_11 = arith.constant 0 : index
      %c0_12 = arith.constant 0 : index
      %13 = vector.load %arg7[%c0_11, %c0_12] : memref<128x128xf32, #tpu.memory_space<vmem>>, vector<128x128xf32>
      tpu.vector_store %arg7[%c0_11, %c0_12], %12 {strides = array<i32>} : memref<128x128xf32, #tpu.memory_space<vmem>>, vector<128x128xf32>,
    } else {
    }
    %c0 = arith.constant 0 : index
    %c0_1 = arith.constant 0 : index
    %3 = vector.load %arg7[%c0, %c0_1] : memref<128x128xf32, #tpu.memory_space<vmem>>, vector<128x128xf32>
    %c0_2 = arith.constant 0 : index
    %c0_3 = arith.constant 0 : index
    %4 = vector.load %arg2[%c0_2, %c0_3] : memref<128x128xbf16, #tpu.memory_space<vmem>>, vector<128x128xbf16>
    %c0_4 = arith.constant 0 : index
    %c0_5 = arith.constant 0 : index
    %5 = vector.load %arg3[%c0_4, %c0_5] : memref<128x128xbf16, #tpu.memory_space<vmem>>, vector<128x128xbf16>
    %cst = arith.constant dense<0.000000e+00> : vector<128x128xf32>
    %6 = tpu.matmul %4, %5, %cst {dimension_numbers = #tpu.dot_dimension_numbers<[1], [0], [0], [1], [0, 0, 1, 1], [], []>} : vector<128x128xbf16>, vector<128x128xbf16>, vector<128x128xf32> -> vector<128x128xf32>
    %7 = arith.addf %3, %6 : vector<128x128xf32>
    %c0_6 = arith.constant 0 : index
    %c0_7 = arith.constant 0 : index
    %8 = vector.load %arg7[%c0_6, %c0_7] : memref<128x128xf32, #tpu.memory_space<vmem>>, vector<128x128xf32>
    tpu.vector_store %arg7[%c0_6, %c0_7], %7 {strides = array<i32>} : memref<128x128xf32, #tpu.memory_space<vmem>>, vector<128x128xf32>,
    %c0_i32_8 = arith.constant 0 : i32
    %9 = arith.cmpi eq, %arg1, %c0_i32_8 : i32
    %10 = arith.extui %9 : i1 to i32
    %c0_i32_9 = arith.constant 0 : i32
    %11 = arith.cmpi ne, %10, %c0_i32_9 : i32
    scf.if %11 {
      %c0_10 = arith.constant 0 : index
      %c0_11 = arith.constant 0 : index
      %12 = vector.load %arg7[%c0_10, %c0_11] : memref<128x128xf32, #tpu.memory_space<vmem>>, vector<128x128xf32>
      %13 = arith.truncf %12 : vector<128x128xf32> to vector<128x128xbf16>
      %c0_12 = arith.constant 0 : index
      %c0_13 = arith.constant 0 : index
      %14 = vector.load %arg4[%c0_12, %c0_13] : memref<128x128xbf16, #tpu.memory_space<vmem>>, vector<128x128xbf16>
      %cst_14 = arith.constant dense<0.000000e+00> : vector<128x128xf32>
      %15 = tpu.matmul %13, %14, %cst_14 {dimension_numbers = #tpu.dot_dimension_numbers<[1], [0], [0], [1], [0, 0, 1, 1], [], []>} : vector<128x128xbf16>, vector<128x128xbf16>, vector<128x128xf32> -> vector<128x128xf32>
      %cst_15 = arith.constant 0.000000e+00 : f32
      %16 = vector.broadcast %cst_15 : f32 to vector<128x128xf32>
      %17 = arith.maximumf %15, %16 : vector<128x128xf32>
      %18 = arith.truncf %17 : vector<128x128xf32> to vector<128x128xbf16>
      %c0_16 = arith.constant 0 : index
      %c0_17 = arith.constant 0 : index
      %19 = vector.load %arg5[%c0_16, %c0_17] : memref<128x128xbf16, #tpu.memory_space<vmem>>, vector<128x128xbf16>
      %cst_18 = arith.constant dense<0.000000e+00> : vector<128x128xf32>
      %20 = tpu.matmul %18, %19, %cst_18 {dimension_numbers = #tpu.dot_dimension_numbers<[1], [0], [0], [1], [0, 0, 1, 1], [], []>} : vector<128x128xbf16>, vector<128x128xbf16>, vector<128x128xf32> -> vector<128x128xf32>
      %c0_19 = arith.constant 0 : index
      %c0_20 = arith.constant 0 : index
      %21 = vector.load %arg6[%c0_19, %c0_20] : memref<128x128xf32, #tpu.memory_space<vmem>>, vector<128x128xf32>
      tpu.vector_store %arg6[%c0_19, %c0_20], %20 {strides = array<i32>} : memref<128x128xf32, #tpu.memory_space<vmem>>, vector<128x128xf32>,
    } else {
    }
    return
  }
  func.func @transform_0(%arg0: i32, %arg1: i32) -> (i32, i32) {
    %c0_i32 = arith.constant 0 : i32
    return %arg0, %arg1 : i32, i32
  }
  func.func @transform_1(%arg0: i32, %arg1: i32) -> (i32, i32) {
    %c0_i32 = arith.constant 0 : i32
    %c0_i32_0 = arith.constant 0 : i32
    return %arg1, %c0_i32 : i32, i32
  }
  func.func @transform_2(%arg0: i32, %arg1: i32) -> (i32, i32) {
    %c0_i32 = arith.constant 0 : i32
    %c0_i32_0 = arith.constant 0 : i32
    %c0_i32_1 = arith.constant 0 : i32
    return %c0_i32, %c0_i32_0 : i32, i32
  }
  func.func @transform_3(%arg0: i32, %arg1: i32) -> (i32, i32) {
    %c0_i32 = arith.constant 0 : i32
    %c0_i32_0 = arith.constant 0 : i32
    %c0_i32_1 = arith.constant 0 : i32
    return %c0_i32, %c0_i32_0 : i32, i32
  }
  func.func @transform_4(%arg0: i32, %arg1: i32) -> (i32, i32) {
    %c0_i32 = arith.constant 0 : i32
    %c0_i32_0 = arith.constant 0 : i32
    return %arg0, %c0_i32 : i32, i32
  }
}

</mosaic_0001>

<bundles_post_ra>
// kernel: tpu_custom_call.1
= control target key start
LH: loop header
LB: loop body
LE: loop exit
PB: predicated region body
PF: predicated region fallthrough
CT: control target
= control target key end

     0   :  { %9 = vsyncpa [#allocation4], 0  ;;  %s1177_s0 = inlined_call_operand.hbm [shape: bf16[128,128], index: 0, kind: input, shape index: {}]   ;;  %s1178_s1 = inlined_call_operand.hbm [shape: bf16[128,128], index: 1, kind: input, shape index: {}]   ;;  %s1179_s2 = inlined_call_operand.hbm [shape: bf16[128,128], index: 2, kind: input, shape index: {}]   ;;  %s1180_s3 = inlined_call_operand.hbm [shape: bf16[128,128], index: 3, kind: input, shape index: {}]   ;;  %s1181_s4 = inlined_call_operand.hbm [shape: f32[128,128], index: 4, kind: output, shape index: {}]  }
   0x1   :  { %10 = vsyncpa [#allocation7], 0 }
   0x2   :  { %11 = vsyncpa [#allocation10], 0 }
   0x3   :  { %12 = vsyncpa [#allocation5], 0  ;;  %s1116_s15 = smov [#allocation6]   ;;  %s1117_s17 = smov [#allocation3]  }
   0x4   :  { %s30_s16 = sshll.u32 %s1116_s15, 4  ;;  %s18_s18 = sshll.u32 %s1117_s17, 4  ;;  %s31_s16 = int_to_ptr.vmem [resolvable:$true] %s30_s16  ;;  %s19_s18 = int_to_ptr.vmem [resolvable:$true] %s18_s18 }
   0x5   :  { %s1016_s19 = scalar_lea.vmem %s31_s16, 1024  ;;  %p1021_p1 = scmp.lt.s32.totalorder %s31_s16, %s31_s16 }
   0x6   :  { %p1017_p0 = scmp.ne.s32.totalorder %s31_s16, %s1016_s19  ;;  %p1022_p2 = scmp.lt.s32.totalorder %s1016_s19, %s1016_s19 }
   0x8   :  { %p1023_p3 = por %p1022_p2, %p1021_p1 }
   0xa   :  { %p1024_p4 = pnand %p1023_p3, %p1017_p0 }
   0xc   :  { %1027 = shalt.err (!%p1024_p4)
}
   0xd   :  { %s1118_s20 = smov 64   ;;  %s1119_s21 = smov 4  }
   0xe   :  { %36 = dma.hbm_to_vmem [thread:$0]  %s1178_s1, 1024, %s31_s16, [#allocation7], %s1118_s20, %s1118_s20, %s1119_s21  }
   0xf   :  { %s1036_s24 = scalar_lea.vmem %s19_s18, 1024  ;;  %p1041_p6 = scmp.lt.s32.totalorder %s19_s18, %s19_s18 }
  0x10   :  { %p1037_p5 = scmp.ne.s32.totalorder %s19_s18, %s1036_s24  ;;  %p1042_p7 = scmp.lt.s32.totalorder %s1036_s24, %s1036_s24 }
  0x12   :  { %p1043_p8 = por %p1042_p7, %p1041_p6 }
  0x14   :  { %p1044_p9 = pnand %p1043_p8, %p1037_p5 }
  0x16   :  { %1047 = shalt.err (!%p1044_p9)
}
  0x17   :  { %24 = dma.hbm_to_vmem [thread:$0]  %s1177_s0, 1024, %s19_s18, [#allocation4], %s1118_s20, %s1118_s20, %s1119_s21  }
  0x18   :  { %s1120_s27 = smov [#allocation8]   ;;  %s1121_s29 = smov [#allocation9]  }
  0x19   :  { %s42_s28 = sshll.u32 %s1120_s27, 4  ;;  %s54_s30 = sshll.u32 %s1121_s29, 4  ;;  %s43_s28 = int_to_ptr.vmem [resolvable:$true] %s42_s28  ;;  %s55_s30 = int_to_ptr.vmem [resolvable:$true] %s54_s30 }
  0x1a   :  { %s1056_s1 = scalar_lea.vmem %s43_s28, 1024  ;;  %p1061_p11 = scmp.lt.s32.totalorder %s43_s28, %s43_s28 }
  0x1b   :  { %p1057_p10 = scmp.ne.s32.totalorder %s43_s28, %s1056_s1  ;;  %p1062_p12 = scmp.lt.s32.totalorder %s1056_s1, %s1056_s1 }
  0x1d   :  { %p1063_p13 = por %p1062_p12, %p1061_p11 }
  0x1f   :  { %p1064_p0 = pnand %p1063_p13, %p1057_p10 }
  0x21   :  { %1067 = shalt.err (!%p1064_p0)
}
  0x22   :  { %48 = dma.hbm_to_vmem [thread:$0]  %s1179_s2, 1024, %s43_s28, [#allocation7], %s1118_s20, %s1118_s20, %s1119_s21  }
  0x23   :  { %s1076_s0 = scalar_lea.vmem %s55_s30, 1024  ;;  %p1081_p2 = scmp.lt.s32.totalorder %s55_s30, %s55_s30 }
  0x24   :  { %p1077_p1 = scmp.ne.s32.totalorder %s55_s30, %s1076_s0  ;;  %p1082_p3 = scmp.lt.s32.totalorder %s1076_s0, %s1076_s0 }
  0x26   :  { %p1083_p4 = por %p1082_p3, %p1081_p2 }
  0x28   :  { %p1084_p5 = pnand %p1083_p4, %p1077_p1 }
  0x2a   :  { %1087 = shalt.err (!%p1084_p5)
}
  0x2b   :  { %60 = dma.hbm_to_vmem [thread:$0]  %s1180_s3, 1024, %s55_s30, [#allocation10], %s1118_s20, %s1118_s20, %s1119_s21  }
  0x2c   :  { %1108 = dma.done.wait [#allocation4], 1024  }
  0x2d   :  { %1109 = vsyncadd [#allocation4], 4294966272 }
  0x2e   :  { %1110 = dma.done.wait [#allocation7], 2048  }
  0x2f   :  { %1111 = vsyncadd [#allocation7], 4294965248 }
  0x30   :  { %1112 = dma.done.wait [#allocation10], 1024  }
  0x31   :  { %1113 = vsyncadd [#allocation10], 4294966272  ;;  %v976_v0 = vld [vmem:[#allocation6 + $0x38] sm:$0xff]   ;;  %v977_v1 = vld [vmem:[#allocation6 + $0x30] sm:$0xff]   ;;  %s1122_s2 = smov [#allocation11]  }
  0x32   :  { %855 = vmatprep.subr.bf16.mxu0 %v976_v0  ;;  %v978_v2 = vld [vmem:[#allocation6 + $0x28] sm:$0xff]   ;;  %v979_v3 = vld [vmem:[#allocation6 + $0x20] sm:$0xff]   ;;  %v980_v5 = vld [vmem:[#allocation6 + $0x18] sm:$0xff]   ;;  %s761_s3 = sshll.u32 %s1122_s2, 4  ;;  %s762_s3 = int_to_ptr.vmem [resolvable:$true] %s761_s3 }
  0x33   :  { %856 = vmatpush3.bf16.msra.mxu0 %v976_v0  ;;  %v984_v4 = vld [vmem:[#allocation3] sm:$0xff]   ;;  %v981_v6 = vld [vmem:[#allocation6 + $0x10] sm:$0xff]   ;;  %v992_v7 = vld [vmem:[#allocation8 + $0x38] sm:$0xff]   ;;  %s1088_s9 = scalar_lea.vmem %s762_s3, 2048  ;;  %p1093_p7 = scmp.lt.s32.totalorder %s762_s3, %s762_s3 }
  0x34   :  { %857 = vmatprep.subr.bf16.mxu0 %v977_v1  ;;  %871 = vmatprep.mubr.bf16.mxu0 %v984_v4  ;;  %v993_v8 = vld [vmem:[#allocation8 + $0x30] sm:$0xff]   ;;  %v982_v9 = vld [vmem:[#allocation6 + $0x8] sm:$0xff]   ;;  %v983_v11 = vld [vmem:[#allocation6] sm:$0xff]   ;;  %p1089_p6 = scmp.ne.s32.totalorder %s762_s3, %s1088_s9  ;;  %p1094_p8 = scmp.lt.s32.totalorder %s1088_s9, %s1088_s9 }
  0x35   :  { %887 = vmatprep.subr.bf16.mxu1 %v992_v7  ;;  %v994_v10 = vld [vmem:[#allocation8 + $0x28] sm:$0xff]   ;;  %v995_v12 = vld [vmem:[#allocation8 + $0x20] sm:$0xff]   ;;  %v996_v13 = vld [vmem:[#allocation8 + $0x18] sm:$0xff]  }
  0x36   :  { %888 = vmatpush3.bf16.msra.mxu1 %v992_v7  ;;  %v985_v14 = vld [vmem:[#allocation3 + $0x8] sm:$0xff]   ;;  %v986_v15 = vld [vmem:[#allocation3 + $0x10] sm:$0xff]   ;;  %v987_v17 = vld [vmem:[#allocation3 + $0x18] sm:$0xff]   ;;  %p1095_p9 = por %p1094_p8, %p1093_p7 }
  0x37   :  { %858 = vmatpush3.bf16.msra.mxu0 %v977_v1  ;;  %889 = vmatprep.subr.bf16.mxu1 %v993_v8  ;;  %v997_v16 = vld [vmem:[#allocation8 + $0x10] sm:$0xff]   ;;  %v988_v18 = vld [vmem:[#allocation3 + $0x20] sm:$0xff]   ;;  %v989_v19 = vld [vmem:[#allocation3 + $0x28] sm:$0xff]  }
  0x38   :  { %859 = vmatprep.subr.bf16.mxu0 %v978_v2  ;;  %v990_v20 = vld [vmem:[#allocation3 + $0x30] sm:$0xff]   ;;  %v991_v21 = vld [vmem:[#allocation3 + $0x38] sm:$0xff]   ;;  %v998_v22 = vld [vmem:[#allocation8 + $0x8] sm:$0xff]   ;;  %p1096_p10 = pnand %p1095_p9, %p1089_p6 }
  0x39   :  { %v999_v23 = vld [vmem:[#allocation8] sm:$0xff]   ;;  %v1000_v24 = vld [vmem:[#allocation9 + $0x38] sm:$0xff]   ;;  %v1001_v25 = vld [vmem:[#allocation9 + $0x30] sm:$0xff]  }
  0x3a   :  { %890 = vmatpush3.bf16.msra.mxu1 %v993_v8  ;;  %v1002_v26 = vld [vmem:[#allocation9 + $0x28] sm:$0xff]   ;;  %v1003_v27 = vld [vmem:[#allocation9 + $0x20] sm:$0xff]   ;;  %v1004_v28 = vld [vmem:[#allocation9 + $0x18] sm:$0xff]  }
  0x3b   :  { %860 = vmatpush3.bf16.msra.mxu0 %v978_v2  ;;  %891 = vmatprep.subr.bf16.mxu1 %v994_v10  ;;  %v1005_v53 = vld [vmem:[#allocation9 + $0x10] sm:$0xff]   ;;  %v1006_v54 = vld [vmem:[#allocation9 + $0x8] sm:$0xff]   ;;  %v1007_v55 = vld [vmem:[#allocation9] sm:$0xff]  }
  0x3c   :  { %861 = vmatprep.subr.bf16.mxu0 %v979_v3 }
  0x3e   :  { %892 = vmatpush3.bf16.msra.mxu1 %v994_v10 }
  0x3f   :  { %862 = vmatpush3.bf16.msra.mxu0 %v979_v3  ;;  %893 = vmatprep.subr.bf16.mxu1 %v995_v12 }
  0x40   :  { %863 = vmatprep.subr.bf16.mxu0 %v980_v5 }
  0x42   :  { %894 = vmatpush3.bf16.msra.mxu1 %v995_v12 }
  0x43   :  { %864 = vmatpush3.bf16.msra.mxu0 %v980_v5  ;;  %895 = vmatprep.subr.bf16.mxu1 %v996_v13 }
  0x44   :  { %865 = vmatprep.subr.bf16.mxu0 %v981_v6 }
  0x46   :  { %896 = vmatpush3.bf16.msra.mxu1 %v996_v13 }
  0x47   :  { %866 = vmatpush3.bf16.msra.mxu0 %v981_v6  ;;  %897 = vmatprep.subr.bf16.mxu1 %v997_v16 }
  0x48   :  { %867 = vmatprep.subr.bf16.mxu0 %v982_v9 }
  0x4a   :  { %898 = vmatpush3.bf16.msra.mxu1 %v997_v16 }
  0x4b   :  { %868 = vmatpush3.bf16.msra.mxu0 %v982_v9  ;;  %899 = vmatprep.subr.bf16.mxu1 %v998_v22 }
  0x4c   :  { %869 = vmatprep.subr.bf16.mxu0 %v983_v11 }
  0x4e   :  { %900 = vmatpush3.bf16.msra.mxu1 %v998_v22 }
  0x4f   :  { %870 = vmatpush3.bf16.msra.mxu0 %v983_v11  ;;  %901 = vmatprep.subr.bf16.mxu1 %v999_v23 }
  0x50   :  { %919 = vmatprep.subr.bf16.mxu0 %v1000_v24 }
  0x52   :  { %872 = vmatmul.mubr.bf16.vlgmr.msra.gmra.mxu0 %v985_v14  ;;  %902 = vmatpush3.bf16.msra.mxu1 %v999_v23 }
  0x53   :  { %875 = vmatprep.mubr.bf16.mxu0 %v986_v15  ;;  %951 = vmatprep.subr.bf16.mxu1 %v1000_v24 }
  0x54   :  { %920 = vmatpush3.bf16.msra.mxu0 %v1000_v24 }
  0x55   :  { %921 = vmatprep.subr.bf16.mxu0 %v1001_v25 }
  0x58   :  { %922 = vmatpush3.bf16.msra.mxu0 %v1001_v25 }
  0x59   :  { %923 = vmatprep.subr.bf16.mxu0 %v1002_v26 }
  0x5a   :  { %876 = vmatmul.mubr.bf16.gmra.mxu0 %v987_v17 }
  0x5b   :  { %879 = vmatprep.mubr.bf16.mxu0 %v988_v18 }
  0x5c   :  { %924 = vmatpush3.bf16.msra.mxu0 %v1002_v26 }
  0x5d   :  { %925 = vmatprep.subr.bf16.mxu0 %v1003_v27 }
  0x60   :  { %926 = vmatpush3.bf16.msra.mxu0 %v1003_v27 }
  0x61   :  { %927 = vmatprep.subr.bf16.mxu0 %v1004_v28 }
  0x62   :  { %880 = vmatmul.mubr.bf16.gmra.mxu0 %v989_v19 }
  0x63   :  { %883 = vmatprep.mubr.bf16.mxu0 %v990_v20 }
  0x64   :  { %928 = vmatpush3.bf16.msra.mxu0 %v1004_v28 }
  0x65   :  { %929 = vmatprep.subr.bf16.mxu0 %v1005_v53 }
  0x68   :  { %930 = vmatpush3.bf16.msra.mxu0 %v1005_v53 }
  0x69   :  { %931 = vmatprep.subr.bf16.mxu0 %v1006_v54 }
  0x6a   :  { %884 = vmatmul.mubr.bf16.gmra.mxu0 %v991_v21 }
  0x6c   :  { %932 = vmatpush3.bf16.msra.mxu0 %v1006_v54 }
  0x6d   :  { %933 = vmatprep.subr.bf16.mxu0 %v1007_v55 }
  0x70   :  { %934 = vmatpush3.bf16.msra.mxu0 %v1007_v55 }
 0x112   :  { %v873_v29 = vpop.f32.mrf.mxu0 }
 0x114   :  { %v272_v30 = vpop.f32.mrf.mxu0 }
 0x116   :  { %v874_v31 = vpop.f32.mrf.mxu0 }
 0x117   :  { %v387_v34 = vpack.c.bf16 %v874_v31, %v873_v29 }
 0x118   :  { %v275_v32 = vpop.f32.mrf.mxu0 }
 0x119   :  { %v386_v33 = vpack.c.bf16 %v275_v32, %v272_v30 }
 0x11a   :  { %v877_v35 = vpop.f32.mrf.mxu0 }
 0x11b   :  { %903 = vmatprep.mubr.bf16.mxu1 %v386_v33 }
 0x11c   :  { %v288_v36 = vpop.f32.mrf.mxu0  ;;  %904 = vmatmul.mubr.bf16.vlgmr.msra.gmra.mxu1 %v387_v34 }
 0x11d   :  { %959 = vmatpush3.bf16.msra.mxu1 %v1000_v24 }
 0x11e   :  { %v878_v37 = vpop.f32.mrf.mxu0  ;;  %952 = vmatprep.subr.bf16.mxu1 %v1001_v25 }
 0x11f   :  { %v389_v40 = vpack.c.bf16 %v878_v37, %v877_v35 }
 0x120   :  { %v291_v38 = vpop.f32.mrf.mxu0 }
 0x121   :  { %v388_v39 = vpack.c.bf16 %v291_v38, %v288_v36  ;;  %960 = vmatpush3.bf16.msra.mxu1 %v1001_v25 }
 0x122   :  { %v881_v41 = vpop.f32.mrf.mxu0  ;;  %953 = vmatprep.subr.bf16.mxu1 %v1002_v26 }
 0x123   :  { %907 = vmatprep.mubr.bf16.mxu1 %v388_v39 }
 0x124   :  { %v304_v42 = vpop.f32.mrf.mxu0  ;;  %908 = vmatmul.mubr.bf16.gmra.mxu1 %v389_v40 }
 0x125   :  { %961 = vmatpush3.bf16.msra.mxu1 %v1002_v26 }
 0x126   :  { %v882_v43 = vpop.f32.mrf.mxu0  ;;  %954 = vmatprep.subr.bf16.mxu1 %v1003_v27 }
 0x127   :  { %v391_v46 = vpack.c.bf16 %v882_v43, %v881_v41 }
 0x128   :  { %v307_v44 = vpop.f32.mrf.mxu0 }
 0x129   :  { %v390_v45 = vpack.c.bf16 %v307_v44, %v304_v42  ;;  %962 = vmatpush3.bf16.msra.mxu1 %v1003_v27 }
 0x12a   :  { %v885_v47 = vpop.f32.mrf.mxu0  ;;  %955 = vmatprep.subr.bf16.mxu1 %v1004_v28 }
 0x12b   :  { %911 = vmatprep.mubr.bf16.mxu1 %v390_v45 }
 0x12c   :  { %v320_v48 = vpop.f32.mrf.mxu0  ;;  %912 = vmatmul.mubr.bf16.gmra.mxu1 %v391_v46 }
 0x12d   :  { %963 = vmatpush3.bf16.msra.mxu1 %v1004_v28 }
 0x12e   :  { %v886_v49 = vpop.f32.mrf.mxu0  ;;  %956 = vmatprep.subr.bf16.mxu1 %v1005_v53 }
 0x12f   :  { %v393_v52 = vpack.c.bf16 %v886_v49, %v885_v47 }
 0x130   :  { %v323_v50 = vpop.f32.mrf.mxu0 }
 0x131   :  { %v392_v51 = vpack.c.bf16 %v323_v50, %v320_v48  ;;  %964 = vmatpush3.bf16.msra.mxu1 %v1005_v53 }
 0x132   :  { %957 = vmatprep.subr.bf16.mxu1 %v1006_v54 }
 0x133   :  { %915 = vmatprep.mubr.bf16.mxu1 %v392_v51 }
 0x134   :  { %916 = vmatmul.mubr.bf16.gmra.mxu1 %v393_v52 }
 0x135   :  { %965 = vmatpush3.bf16.msra.mxu1 %v1006_v54 }
 0x136   :  { %958 = vmatprep.subr.bf16.mxu1 %v1007_v55 }
 0x139   :  { %966 = vmatpush3.bf16.msra.mxu1 %v1007_v55 }
 0x1dc   :  { %v905_v56 = vpop.f32.mrf.mxu1 }
 0x1dd   :  { %v557_v63 = vmax.f32 %v905_v56, 0.0 }
 0x1de   :  { %v492_v57 = vpop.f32.mrf.mxu1 }
 0x1df   :  { %v555_v61 = vmax.f32 %v492_v57, 0.0 }
 0x1e0   :  { %v906_v58 = vpop.f32.mrf.mxu1 }
 0x1e1   :  { %v558_v59 = vmax.f32 %v906_v58, 0.0 }
 0x1e2   :  { %v495_v60 = vpop.f32.mrf.mxu1 }
 0x1e3   :  { %v556_v62 = vmax.f32 %v495_v60, 0.0  ;;  %v572_v2 = vpack.c.bf16 %v558_v59, %v557_v63 }
 0x1e4   :  { %v909_v0 = vpop.f32.mrf.mxu1 }
 0x1e5   :  { %v571_v1 = vpack.c.bf16 %v556_v62, %v555_v61  ;;  %v561_v9 = vmax.f32 %v909_v0, 0.0 }
 0x1e6   :  { %v508_v3 = vpop.f32.mrf.mxu1 }
 0x1e7   :  { %935 = vmatprep.mubr.bf16.mxu0 %v571_v1  ;;  %v559_v7 = vmax.f32 %v508_v3, 0.0 }
 0x1e8   :  { %v910_v4 = vpop.f32.mrf.mxu1  ;;  %936 = vmatmul.mubr.bf16.vlgmr.msra.gmra.mxu0 %v572_v2 }
 0x1e9   :  { %v562_v5 = vmax.f32 %v910_v4, 0.0 }
 0x1ea   :  { %v511_v6 = vpop.f32.mrf.mxu1 }
 0x1eb   :  { %v560_v8 = vmax.f32 %v511_v6, 0.0  ;;  %v574_v12 = vpack.c.bf16 %v562_v5, %v561_v9 }
 0x1ec   :  { %v913_v10 = vpop.f32.mrf.mxu1 }
 0x1ed   :  { %v573_v11 = vpack.c.bf16 %v560_v8, %v559_v7  ;;  %v565_v19 = vmax.f32 %v913_v10, 0.0 }
 0x1ee   :  { %v524_v13 = vpop.f32.mrf.mxu1 }
 0x1ef   :  { %939 = vmatprep.mubr.bf16.mxu0 %v573_v11  ;;  %v563_v17 = vmax.f32 %v524_v13, 0.0 }
 0x1f0   :  { %v914_v14 = vpop.f32.mrf.mxu1  ;;  %940 = vmatmul.mubr.bf16.gmra.mxu0 %v574_v12 }
 0x1f1   :  { %v566_v15 = vmax.f32 %v914_v14, 0.0 }
 0x1f2   :  { %v527_v16 = vpop.f32.mrf.mxu1 }
 0x1f3   :  { %v564_v18 = vmax.f32 %v527_v16, 0.0  ;;  %v576_v22 = vpack.c.bf16 %v566_v15, %v565_v19 }
 0x1f4   :  { %v917_v20 = vpop.f32.mrf.mxu1 }
 0x1f5   :  { %v575_v21 = vpack.c.bf16 %v564_v18, %v563_v17  ;;  %v569_v29 = vmax.f32 %v917_v20, 0.0 }
 0x1f6   :  { %v540_v23 = vpop.f32.mrf.mxu1 }
 0x1f7   :  { %943 = vmatprep.mubr.bf16.mxu1 %v575_v21  ;;  %v567_v27 = vmax.f32 %v540_v23, 0.0 }
 0x1f8   :  { %v918_v24 = vpop.f32.mrf.mxu1  ;;  %944 = vmatmul.mubr.bf16.vlgmr.msra.gmra.mxu1 %v576_v22 }
 0x1f9   :  { %v570_v25 = vmax.f32 %v918_v24, 0.0 }
 0x1fa   :  { %v543_v26 = vpop.f32.mrf.mxu1 }
 0x1fb   :  { %v568_v28 = vmax.f32 %v543_v26, 0.0  ;;  %v578_v31 = vpack.c.bf16 %v570_v25, %v569_v29 }
 0x1fd   :  { %v577_v30 = vpack.c.bf16 %v568_v28, %v567_v27 }
 0x1ff   :  { %947 = vmatprep.mubr.bf16.mxu1 %v577_v30 }
 0x200   :  { %948 = vmatmul.mubr.bf16.gmra.mxu1 %v578_v31 }
 0x2a8   :  { %v937_v32 = vpop.f32.mrf.mxu0 }
 0x2a9   :  { %742 = vst [vmem:[#allocation11 + $0x10] sm:$0xff] %v937_v32 }
 0x2aa   :  { %v677_v33 = vpop.f32.mrf.mxu0 }
 0x2ab   :  { %740 = vst [vmem:[#allocation11] sm:$0xff] %v677_v33 }
 0x2ac   :  { %v938_v34 = vpop.f32.mrf.mxu0 }
 0x2ad   :  { %743 = vst [vmem:[#allocation11 + $0x18] sm:$0xff] %v938_v34 }
 0x2ae   :  { %v680_v35 = vpop.f32.mrf.mxu0 }
 0x2af   :  { %741 = vst [vmem:[#allocation11 + $0x8] sm:$0xff] %v680_v35 }
 0x2b0   :  { %v941_v36 = vpop.f32.mrf.mxu0 }
 0x2b1   :  { %746 = vst [vmem:[#allocation11 + $0x30] sm:$0xff] %v941_v36 }
 0x2b2   :  { %v693_v37 = vpop.f32.mrf.mxu0 }
 0x2b3   :  { %744 = vst [vmem:[#allocation11 + $0x20] sm:$0xff] %v693_v37 }
 0x2b4   :  { %v942_v38 = vpop.f32.mrf.mxu0 }
 0x2b5   :  { %747 = vst [vmem:[#allocation11 + $0x38] sm:$0xff] %v942_v38 }
 0x2b6   :  { %v696_v39 = vpop.f32.mrf.mxu0 }
 0x2b7   :  { %745 = vst [vmem:[#allocation11 + $0x28] sm:$0xff] %v696_v39 }
 0x2b8   :  { %v945_v40 = vpop.f32.mrf.mxu1 }
 0x2b9   :  { %750 = vst [vmem:[#allocation11 + $0x50] sm:$0xff] %v945_v40 }
 0x2ba   :  { %v709_v41 = vpop.f32.mrf.mxu1 }
 0x2bb   :  { %748 = vst [vmem:[#allocation11 + $0x40] sm:$0xff] %v709_v41 }
 0x2bc   :  { %v946_v42 = vpop.f32.mrf.mxu1 }
 0x2bd   :  { %751 = vst [vmem:[#allocation11 + $0x58] sm:$0xff] %v946_v42 }
 0x2be   :  { %v712_v43 = vpop.f32.mrf.mxu1 }
 0x2bf   :  { %749 = vst [vmem:[#allocation11 + $0x48] sm:$0xff] %v712_v43 }
 0x2c0   :  { %v949_v44 = vpop.f32.mrf.mxu1 }
 0x2c1   :  { %754 = vst [vmem:[#allocation11 + $0x70] sm:$0xff] %v949_v44 }
 0x2c2   :  { %v725_v45 = vpop.f32.mrf.mxu1 }
 0x2c3   :  { %752 = vst [vmem:[#allocation11 + $0x60] sm:$0xff] %v725_v45 }
 0x2c4   :  { %v950_v46 = vpop.f32.mrf.mxu1 }
 0x2c5   :  { %755 = vst [vmem:[#allocation11 + $0x78] sm:$0xff] %v950_v46 }
 0x2c6   :  { %v728_v47 = vpop.f32.mrf.mxu1 }
 0x2c7   :  { %753 = vst [vmem:[#allocation11 + $0x68] sm:$0xff] %v728_v47 }
 0x2c8   :  { %1099 = shalt.err (!%p1096_p10)
}
 0x2c9   :  { %s1123_s10 = smov 128   ;;  %s1124_s11 = smov 8  }
 0x2ca   :  { %767 = dma.vmem_to_hbm [thread:$0]  %s762_s3, 2048, %s1181_s4, [#allocation5], %s1123_s10, %s1123_s10, %s1124_s11  }
 0x2cb   :  { %1114 = dma.done.wait [#allocation5], 2048  }
 0x2cc   :  { %1115 = vsyncadd [#allocation5], 4294965248 }
 0x2cd   :  { %771 = vsyncpa [#allocation4], 1 }
 0x2ce   :  { %772 = vsyncpa [#allocation7], 1 }
 0x2cf   :  { %773 = vsyncpa [#allocation10], 1 }
 0x2d0   :  { %774 = vsyncpa [#allocation5], 1 }

</bundles_post_ra>
